<compile_context>
chip_gen: v5e
topology: v5e:2x2
jax: 0.10.0
libtpu: 0.0.40
codegen_flags: <defaults>
</compile_context>

<pallas_src>
import jax
import jax.numpy as jnp
from jax.experimental import pallas as pl
from jax.experimental.pallas import tpu as pltpu

# Hyper-parameters fixed by TranAD_Transformer.__init__
N_HIDDEN = 6
N_WINDOW = 10


def _rup(x, m):
    return ((x + m - 1) // m) * m


def _pick_tile_b(b_pad):
    """Lane-axis batch tile: 128..512 lanes, preferring >= 2 grid steps so the
    'parallel' grid axis shards across v7x's two TensorCores."""
    for tile in (512, 256, 128):
        if b_pad % tile == 0 and b_pad // tile >= 2:
            return tile
    return min(b_pad, 512)          # single-tile batches (b_pad <= 512)


# --------------------------- packing layout --------------------------------- #

def _pack_layout(feats):
    """Static packing layout (row offsets + logical shapes) of every weight /
    bias inside the two packed operand arrays.  Pure Python; depends only on
    `feats` and the fixed hyper-params, so the host-side prepare_params and the
    traced kernel builder share it."""
    W, F, H = N_WINDOW, feats, N_HIDDEN
    N = 2 * F * W
    HP, NP, FP, F2P = _rup(H, 8), _rup(N, 8), _rup(F, 8), _rup(2 * F, 8)

    w_entries = (                       # name, padded rows (out), cols (in)
        ("we1s", HP, W * F), ("we1c", HP, W * F),
        ("we2", NP, HP),
        ("wd1a", HP, NP), ("wd1b", F2P, HP),
        ("wd2a", HP, NP), ("wd2b", F2P, HP),
        ("wf", FP, F2P),
    )
    b_entries = (("be1", HP), ("be2", NP), ("bd1a", HP), ("bd1b", F2P),
                 ("bd2a", HP), ("bd2b", F2P), ("bf", FP))

    w_off, off = {}, 0
    for name, rows, cols in w_entries:
        w_off[name] = (off, rows, cols)
        off += rows
    w_rows = off
    w_cols = _rup(max(c for _, _, c in w_entries), 128)

    b_off, off = {}, 0
    for name, rows in b_entries:
        b_off[name] = (off, rows)
        off += rows
    b_rows = off

    dims = dict(W=W, F=F, N=N, HP=HP, NP=NP, FP=FP, F2P=F2P,
                w_rows=w_rows, w_cols=w_cols, b_rows=b_rows)
    return w_off, b_off, dims


# ------------------------------ parameters ---------------------------------- #

def init_params(key, feats):
    """Deterministic synthetic parameters; shapes match the nn.Module __init__.
    Weights are stored as (fan_in, fan_out); biases as (1, fan_out)."""
    n = 2 * feats * N_WINDOW

    def linear(k, fan_in, fan_out):
        kw, kb = jax.random.split(k)
        bound = 1.0 / (fan_in ** 0.5)
        w = jax.random.uniform(kw, (fan_in, fan_out), jnp.float32, -bound, bound)
        b = jax.random.uniform(kb, (1, fan_out), jnp.float32, -bound, bound)
        return w, b

    ks = jax.random.split(key, 7)
    return {
        "enc1":  linear(ks[0], n, N_HIDDEN),
        "enc2":  linear(ks[1], N_HIDDEN, n),
        "dec1a": linear(ks[2], n, N_HIDDEN),
        "dec1b": linear(ks[3], N_HIDDEN, 2 * feats),
        "dec2a": linear(ks[4], n, N_HIDDEN),
        "dec2b": linear(ks[5], N_HIDDEN, 2 * feats),
        "fcn":   linear(ks[6], 2 * feats, feats),
    }


def prepare_params(params, feats):
    """One-time host-side layout prep (hoisted out of the forward path):
      * transpose all weights to (out, in),
      * split the enc1 weight into the src / c halves of the interleaved
        cat(src, c) input,
      * zero-pad out/in dims to sublane-aligned sizes (6 -> 8, etc.),
      * pack all weights into one bf16 array and all biases into one f32 array.
    Zero padding is exact: padded weight rows + zero biases stay 0 through
    ReLU, and padded contraction columns multiply zeroed activation rows."""
    W, F = N_WINDOW, feats
    w_off, b_off, d = _pack_layout(feats)

    we1, be1 = params["enc1"]                               # (n, H), (1, H)
    we1_r = we1.reshape(W, 2 * F, N_HIDDEN)
    weights = {
        "we1s": we1_r[:, :F, :].reshape(W * F, N_HIDDEN).T,     # (H, W*F)
        "we1c": we1_r[:, F:, :].reshape(W * F, N_HIDDEN).T,     # (H, W*F)
        "we2":  params["enc2"][0].T,
        "wd1a": params["dec1a"][0].T, "wd1b": params["dec1b"][0].T,
        "wd2a": params["dec2a"][0].T, "wd2b": params["dec2b"][0].T,
        "wf":   params["fcn"][0].T,
    }
    biases = {
        "be1": be1, "be2": params["enc2"][1],
        "bd1a": params["dec1a"][1], "bd1b": params["dec1b"][1],
        "bd2a": params["dec2a"][1], "bd2b": params["dec2b"][1],
        "bf":  params["fcn"][1],
    }

    wpack = jnp.zeros((d["w_rows"], d["w_cols"]), jnp.float32)
    for name, (r, _, _) in w_off.items():
        w = weights[name]
        wpack = wpack.at[r:r + w.shape[0], :w.shape[1]].set(w)

    bpack = jnp.zeros((d["b_rows"], 1), jnp.float32)
    for name, (r, _) in b_off.items():
        b = biases[name].reshape(-1, 1)
        bpack = bpack.at[r:r + b.shape[0], :].set(b)

    return {"w": wpack.astype(jnp.bfloat16), "b": bpack}


# ----------------------------- Pallas kernel -------------------------------- #

def _build_kernel(feats):
    w_off, b_off, d = _pack_layout(feats)
    W, F, FP = d["W"], d["F"], d["FP"]

    def kernel(src_ref, w_ref, b_ref, out_ref):
        def wslab(name):
            r, rows, cols = w_off[name]
            return w_ref[r:r + rows, 0:cols]       # static, sublane-aligned window (bf16)

        def bslab(name):
            r, rows = b_off[name]
            return b_ref[r:r + rows, :]            # (rows, 1) f32, lane-broadcasts in the add

        def mm(a, x):
            # bf16 MXU operands, f32 accumulation
            return jnp.dot(a, x, preferred_element_type=jnp.float32)

        def sigmoid(z):
            # exp runs on the EUP; approx reciprocal keeps the divide off the VALU slot
            return pl.reciprocal(1.0 + jnp.exp(-z), approx=True)

        def tail(h, wa, ba, wb, bb):
            # enc linear-2 -> ReLU -> decoder (2 linears, ReLU) -> fcn -> Sigmoid
            # NOTE: the K=8/K=16 matmuls run at low MXU utilization; lowering them to
            # unrolled VPU FMAs is only worthwhile if a bundle profile shows the MXU
            # pass count binding, so it is intentionally not done here.
            e = jnp.maximum(mm(wslab("we2"), h.astype(jnp.bfloat16))
                            + bslab("be2"), 0.0)                              # (NP, TB)
            t = jnp.maximum(mm(wslab(wa), e.astype(jnp.bfloat16))
                            + bslab(ba), 0.0)                                 # (HP, TB)
            t = jnp.maximum(mm(wslab(wb), t.astype(jnp.bfloat16))
                            + bslab(bb), 0.0)                                 # (F2P, TB)
            return sigmoid(mm(wslab("wf"), t.astype(jnp.bfloat16))
                           + bslab("bf"))                                     # (FP, TB) f32

        src = src_ref[...]                                                    # (W*F, TB) bf16

        # enc1 pre-activation from the src half of cat(src, c); shared by both
        # stages (stage 1 has c == 0, so only this half contributes there).
        pre_src = mm(wslab("we1s"), src) + bslab("be1")                       # (HP, TB) f32

        # ---- stage 1 ----
        x1 = tail(jnp.maximum(pre_src, 0.0), "wd1a", "bd1a", "wd1b", "bd1b")
        out_ref[0:FP, :] = x1

        # ---- stage 2: c = (x1 - src)^2 with x1 broadcast over the window ----
        x1_tiled = jnp.tile(x1[0:F, :], (W, 1))                               # (W*F, TB) f32
        diff = x1_tiled - src.astype(jnp.float32)                             # elementwise in f32
        c = (diff * diff).astype(jnp.bfloat16)
        h2 = jnp.maximum(pre_src + mm(wslab("we1c"), c), 0.0)
        x2 = tail(h2, "wd2a", "bd2a", "wd2b", "bd2b")
        out_ref[FP:2 * FP, :] = x2

    return kernel


# -------------------------------- forward ----------------------------------- #

def tranad_forward(prep, src, tgt):
    """Pallas implementation of TranAD_Transformer.forward.

    prep: output of prepare_params().  src, tgt: (n_window, batch, feats);
    tgt is unused, matching the PyTorch code (encode() overwrites it).
    Returns (x1, x2), each (1, batch, feats) float32."""
    del tgt
    W, B, F = src.shape
    assert W == N_WINDOW
    _, _, d = _pack_layout(F)
    FP = d["FP"]

    # layout plumbing: PyTorch permute(1,0,2).flatten(1), then transposed so the
    # batch dimension sits on the 128-lane axis: src_t[w*F+f, b] = src[w, b, f].
    # bf16 halves the dominant HBM traffic; accumulation stays f32 in-kernel.
    src_t = jnp.transpose(src, (0, 2, 1)).reshape(W * F, B).astype(jnp.bfloat16)

    b_pad = _rup(B, 128)
    if b_pad != B:
        # zero-padded lanes flow through finite math only and are sliced off below
        src_t = jnp.pad(src_t, ((0, 0), (0, b_pad - B)))
    tile_b = _pick_tile_b(b_pad)
    grid = (b_pad // tile_b,)

    out = pl.pallas_call(
        _build_kernel(F),
        out_shape=jax.ShapeDtypeStruct((2 * FP, b_pad), jnp.float32),
        grid=grid,
        in_specs=[
            pl.BlockSpec((W * F, tile_b), lambda i: (0, i)),      # src batch tile
            pl.BlockSpec(prep["w"].shape, lambda i: (0, 0)),      # packed weights (resident)
            pl.BlockSpec(prep["b"].shape, lambda i: (0, 0)),      # packed biases  (resident)
        ],
        out_specs=pl.BlockSpec((2 * FP, tile_b), lambda i: (0, i)),
        compiler_params=pltpu.CompilerParams(
            dimension_semantics=("parallel",)),
    )(src_t, prep["w"], prep["b"])

    x1 = out[0:F, :B].T[None, :, :]            # (1, B, F)
    x2 = out[FP:FP + F, :B].T[None, :, :]      # (1, B, F)
    return x1, x2


# --------------------------- pure-JAX reference ------------------------------ #

def reference_forward(params, src):
    W, B, F = src.shape
    n = 2 * F * N_WINDOW

    def seq(x, l1, l2):
        h = jnp.maximum(x @ l1[0] + l1[1], 0.0)
        return jnp.maximum(h @ l2[0] + l2[1], 0.0)

    def encode(s, c):
        x = jnp.concatenate([s, c], axis=2)                       # (W, B, 2F)
        x = jnp.transpose(x, (1, 0, 2)).reshape(B, n)             # (B, n)
        return seq(x, params["enc1"], params["enc2"])

    def fcn(x):
        return jax.nn.sigmoid(x @ params["fcn"][0] + params["fcn"][1])

    with jax.default_matmul_precision("highest"):
        c0 = jnp.zeros_like(src)
        x1 = seq(encode(src, c0), params["dec1a"], params["dec1b"])   # (B, 2F)
        x1 = fcn(jnp.transpose(x1.reshape(-1, 1, 2 * F), (1, 0, 2)))  # (1, B, F)
        c = (x1 - src) ** 2                                           # (W, B, F)
        x2 = seq(encode(src, c), params["dec2a"], params["dec2b"])
        x2 = fcn(jnp.transpose(x2.reshape(-1, 1, 2 * F), (1, 0, 2)))
    return x1, x2


# --------------------------------- main -------------------------------------- #

if __name__ == "__main__":
    feats = 8
    batch = 16

    key = jax.random.PRNGKey(0)
    k_params, k_src, k_tgt = jax.random.split(key, 3)

    params = init_params(k_params, feats)
    prep = prepare_params(params, feats)     # one-time layout/packing prep (outside jit)
    src = jax.random.normal(k_src, (N_WINDOW, batch, feats), jnp.float32)
    tgt = jax.random.normal(k_tgt, (N_WINDOW, batch, feats), jnp.float32)

    fwd = jax.jit(tranad_forward)
    x1, x2 = fwd(prep, src, tgt)
    jax.block_until_ready((x1, x2))

    # correctness check vs. pure-f32 reference of the PyTorch forward.  The
    # kernel runs its matmuls with bf16 operands (f32 accumulation) and an
    # approx-reciprocal sigmoid, so the tolerance covers bf16 operand rounding.
    r1, r2 = reference_forward(params, src)
    assert x1.shape == (1, batch, feats) and x2.shape == (1, batch, feats)
    tol = 5e-2
    assert float(jnp.max(jnp.abs(x1 - r1))) < tol, "x1 mismatch"
    assert float(jnp.max(jnp.abs(x2 - r2))) < tol, "x2 mismatch"

    print("KERNEL_OK")
</pallas_src>

<mosaic_0001>
module attributes {stable_mosaic.version = 11 : i64} {
  func.func @kernel(%arg0: i32, %arg1: memref<80x128xbf16, #tpu.memory_space<vmem>>, %arg2: memref<232x256xbf16, #tpu.memory_space<vmem>>, %arg3: memref<224x1xf32, #tpu.memory_space<vmem>>, %arg4: memref<16x128xf32, #tpu.memory_space<vmem>>) attributes {dimension_semantics = [#tpu.dimension_semantics<parallel>], iteration_bounds = array<i64: 1>, scalar_prefetch = 0 : i64, scratch_operands = 0 : i64, tpu.core_type = #tpu.core_type<tc>, window_params = [{transform_indices = @transform_0, window_bounds = array<i64: 80, 128>}, {pipeline_mode = #tpu.pipeline_mode<synchronous>, transform_indices = @transform_1, window_bounds = array<i64: 232, 256>}, {pipeline_mode = #tpu.pipeline_mode<synchronous>, transform_indices = @transform_2, window_bounds = array<i64: 224, 1>}, {transform_indices = @transform_3, window_bounds = array<i64: 16, 128>}]} {
    %c0 = arith.constant 0 : index
    %c0_0 = arith.constant 0 : index
    %0 = vector.load %arg1[%c0, %c0_0] : memref<80x128xbf16, #tpu.memory_space<vmem>>, vector<80x128xbf16>
    %c0_1 = arith.constant 0 : index
    %c0_2 = arith.constant 0 : index
    %1 = vector.load %arg2[%c0_1, %c0_2] : memref<232x256xbf16, #tpu.memory_space<vmem>>, vector<8x80xbf16>
    %cst = arith.constant dense<0.000000e+00> : vector<8x128xf32>
    %2 = tpu.matmul %1, %0, %cst {dimension_numbers = #tpu.dot_dimension_numbers<[1], [0], [0], [1], [0, 0, 1, 1], [], []>} : vector<8x80xbf16>, vector<80x128xbf16>, vector<8x128xf32> -> vector<8x128xf32>
    %c0_3 = arith.constant 0 : index
    %c0_4 = arith.constant 0 : index
    %3 = vector.load %arg3[%c0_3, %c0_4] : memref<224x1xf32, #tpu.memory_space<vmem>>, vector<8x1xf32>
    %4 = vector.broadcast %3 : vector<8x1xf32> to vector<8x128xf32>
    %5 = arith.addf %2, %4 : vector<8x128xf32>
    %cst_5 = arith.constant 0.000000e+00 : f32
    %6 = vector.broadcast %cst_5 : f32 to vector<8x128xf32>
    %7 = arith.maximumf %5, %6 : vector<8x128xf32>
    %c16 = arith.constant 16 : index
    %c0_6 = arith.constant 0 : index
    %8 = vector.load %arg2[%c16, %c0_6] : memref<232x256xbf16, #tpu.memory_space<vmem>>, vector<160x8xbf16>
    %9 = arith.truncf %7 : vector<8x128xf32> to vector<8x128xbf16>
    %cst_7 = arith.constant dense<0.000000e+00> : vector<160x128xf32>
    %10 = tpu.matmul %8, %9, %cst_7 {dimension_numbers = #tpu.dot_dimension_numbers<[1], [0], [0], [1], [0, 0, 1, 1], [], []>} : vector<160x8xbf16>, vector<8x128xbf16>, vector<160x128xf32> -> vector<160x128xf32>
    %c8 = arith.constant 8 : index
    %c0_8 = arith.constant 0 : index
    %11 = vector.load %arg3[%c8, %c0_8] : memref<224x1xf32, #tpu.memory_space<vmem>>, vector<160x1xf32>
    %12 = vector.broadcast %11 : vector<160x1xf32> to vector<160x128xf32>
    %13 = arith.addf %10, %12 : vector<160x128xf32>
    %cst_9 = arith.constant 0.000000e+00 : f32
    %14 = vector.broadcast %cst_9 : f32 to vector<160x128xf32>
    %15 = arith.maximumf %13, %14 : vector<160x128xf32>
    %c176 = arith.constant 176 : index
    %c0_10 = arith.constant 0 : index
    %16 = vector.load %arg2[%c176, %c0_10] : memref<232x256xbf16, #tpu.memory_space<vmem>>, vector<8x160xbf16>
    %17 = arith.truncf %15 : vector<160x128xf32> to vector<160x128xbf16>
    %cst_11 = arith.constant dense<0.000000e+00> : vector<8x128xf32>
    %18 = tpu.matmul %16, %17, %cst_11 {dimension_numbers = #tpu.dot_dimension_numbers<[1], [0], [0], [1], [0, 0, 1, 1], [], []>} : vector<8x160xbf16>, vector<160x128xbf16>, vector<8x128xf32> -> vector<8x128xf32>
    %c168 = arith.constant 168 : index
    %c0_12 = arith.constant 0 : index
    %19 = vector.load %arg3[%c168, %c0_12] : memref<224x1xf32, #tpu.memory_space<vmem>>, vector<8x1xf32>
    %20 = vector.broadcast %19 : vector<8x1xf32> to vector<8x128xf32>
    %21 = arith.addf %18, %20 : vector<8x128xf32>
    %cst_13 = arith.constant 0.000000e+00 : f32
    %22 = vector.broadcast %cst_13 : f32 to vector<8x128xf32>
    %23 = arith.maximumf %21, %22 : vector<8x128xf32>
    %c184 = arith.constant 184 : index
    %c0_14 = arith.constant 0 : index
    %24 = vector.load %arg2[%c184, %c0_14] : memref<232x256xbf16, #tpu.memory_space<vmem>>, vector<16x8xbf16>
    %25 = arith.truncf %23 : vector<8x128xf32> to vector<8x128xbf16>
    %cst_15 = arith.constant dense<0.000000e+00> : vector<16x128xf32>
    %26 = tpu.matmul %24, %25, %cst_15 {dimension_numbers = #tpu.dot_dimension_numbers<[1], [0], [0], [1], [0, 0, 1, 1], [], []>} : vector<16x8xbf16>, vector<8x128xbf16>, vector<16x128xf32> -> vector<16x128xf32>
    %c176_16 = arith.constant 176 : index
    %c0_17 = arith.constant 0 : index
    %27 = vector.load %arg3[%c176_16, %c0_17] : memref<224x1xf32, #tpu.memory_space<vmem>>, vector<16x1xf32>
    %28 = vector.broadcast %27 : vector<16x1xf32> to vector<16x128xf32>
    %29 = arith.addf %26, %28 : vector<16x128xf32>
    %cst_18 = arith.constant 0.000000e+00 : f32
    %30 = vector.broadcast %cst_18 : f32 to vector<16x128xf32>
    %31 = arith.maximumf %29, %30 : vector<16x128xf32>
    %c224 = arith.constant 224 : index
    %c0_19 = arith.constant 0 : index
    %32 = vector.load %arg2[%c224, %c0_19] : memref<232x256xbf16, #tpu.memory_space<vmem>>, vector<8x16xbf16>
    %33 = arith.truncf %31 : vector<16x128xf32> to vector<16x128xbf16>
    %cst_20 = arith.constant dense<0.000000e+00> : vector<8x128xf32>
    %34 = tpu.matmul %32, %33, %cst_20 {dimension_numbers = #tpu.dot_dimension_numbers<[1], [0], [0], [1], [0, 0, 1, 1], [], []>} : vector<8x16xbf16>, vector<16x128xbf16>, vector<8x128xf32> -> vector<8x128xf32>
    %c216 = arith.constant 216 : index
    %c0_21 = arith.constant 0 : index
    %35 = vector.load %arg3[%c216, %c0_21] : memref<224x1xf32, #tpu.memory_space<vmem>>, vector<8x1xf32>
    %36 = vector.broadcast %35 : vector<8x1xf32> to vector<8x128xf32>
    %37 = arith.addf %34, %36 : vector<8x128xf32>
    %cst_22 = arith.constant 0.000000e+00 : f32
    %38 = vector.broadcast %cst_22 : f32 to vector<8x128xf32>
    %39 = arith.subf %38, %37 : vector<8x128xf32>
    %40 = math.exp %39 : vector<8x128xf32>
    %cst_23 = arith.constant 1.000000e+00 : f32
    %41 = vector.broadcast %cst_23 : f32 to vector<8x128xf32>
    %42 = arith.addf %41, %40 : vector<8x128xf32>
    %43 = tpu.reciprocal %42 {approx = true} : vector<8x128xf32> -> vector<8x128xf32>
    %c0_24 = arith.constant 0 : index
    %c0_25 = arith.constant 0 : index
    %44 = vector.load %arg4[%c0_24, %c0_25] : memref<16x128xf32, #tpu.memory_space<vmem>>, vector<8x128xf32>
    tpu.vector_store %arg4[%c0_24, %c0_25], %43 {strides = array<i32>} : memref<16x128xf32, #tpu.memory_space<vmem>>, vector<8x128xf32>,
    %45 = tpu.concatenate %43, %43, %43, %43, %43, %43, %43, %43, %43, %43 in 0 : vector<8x128xf32>, vector<8x128xf32>, vector<8x128xf32>, vector<8x128xf32>, vector<8x128xf32>, vector<8x128xf32>, vector<8x128xf32>, vector<8x128xf32>, vector<8x128xf32>, vector<8x128xf32> -> vector<80x128xf32>
    %46 = arith.extf %0 : vector<80x128xbf16> to vector<80x128xf32>
    %47 = arith.subf %45, %46 : vector<80x128xf32>
    %48 = arith.mulf %47, %47 : vector<80x128xf32>
    %49 = arith.truncf %48 : vector<80x128xf32> to vector<80x128xbf16>
    %c8_26 = arith.constant 8 : index
    %c0_27 = arith.constant 0 : index
    %50 = vector.load %arg2[%c8_26, %c0_27] : memref<232x256xbf16, #tpu.memory_space<vmem>>, vector<8x80xbf16>
    %cst_28 = arith.constant dense<0.000000e+00> : vector<8x128xf32>
    %51 = tpu.matmul %50, %49, %cst_28 {dimension_numbers = #tpu.dot_dimension_numbers<[1], [0], [0], [1], [0, 0, 1, 1], [], []>} : vector<8x80xbf16>, vector<80x128xbf16>, vector<8x128xf32> -> vector<8x128xf32>
    %52 = arith.addf %5, %51 : vector<8x128xf32>
    %cst_29 = arith.constant 0.000000e+00 : f32
    %53 = vector.broadcast %cst_29 : f32 to vector<8x128xf32>
    %54 = arith.maximumf %52, %53 : vector<8x128xf32>
    %c16_30 = arith.constant 16 : index
    %c0_31 = arith.constant 0 : index
    %55 = vector.load %arg2[%c16_30, %c0_31] : memref<232x256xbf16, #tpu.memory_space<vmem>>, vector<160x8xbf16>
    %56 = arith.truncf %54 : vector<8x128xf32> to vector<8x128xbf16>
    %cst_32 = arith.constant dense<0.000000e+00> : vector<160x128xf32>
    %57 = tpu.matmul %55, %56, %cst_32 {dimension_numbers = #tpu.dot_dimension_numbers<[1], [0], [0], [1], [0, 0, 1, 1], [], []>} : vector<160x8xbf16>, vector<8x128xbf16>, vector<160x128xf32> -> vector<160x128xf32>
    %c8_33 = arith.constant 8 : index
    %c0_34 = arith.constant 0 : index
    %58 = vector.load %arg3[%c8_33, %c0_34] : memref<224x1xf32, #tpu.memory_space<vmem>>, vector<160x1xf32>
    %59 = vector.broadcast %58 : vector<160x1xf32> to vector<160x128xf32>
    %60 = arith.addf %57, %59 : vector<160x128xf32>
    %cst_35 = arith.constant 0.000000e+00 : f32
    %61 = vector.broadcast %cst_35 : f32 to vector<160x128xf32>
    %62 = arith.maximumf %60, %61 : vector<160x128xf32>
    %c200 = arith.constant 200 : index
    %c0_36 = arith.constant 0 : index
    %63 = vector.load %arg2[%c200, %c0_36] : memref<232x256xbf16, #tpu.memory_space<vmem>>, vector<8x160xbf16>
    %64 = arith.truncf %62 : vector<160x128xf32> to vector<160x128xbf16>
    %cst_37 = arith.constant dense<0.000000e+00> : vector<8x128xf32>
    %65 = tpu.matmul %63, %64, %cst_37 {dimension_numbers = #tpu.dot_dimension_numbers<[1], [0], [0], [1], [0, 0, 1, 1], [], []>} : vector<8x160xbf16>, vector<160x128xbf16>, vector<8x128xf32> -> vector<8x128xf32>
    %c192 = arith.constant 192 : index
    %c0_38 = arith.constant 0 : index
    %66 = vector.load %arg3[%c192, %c0_38] : memref<224x1xf32, #tpu.memory_space<vmem>>, vector<8x1xf32>
    %67 = vector.broadcast %66 : vector<8x1xf32> to vector<8x128xf32>
    %68 = arith.addf %65, %67 : vector<8x128xf32>
    %cst_39 = arith.constant 0.000000e+00 : f32
    %69 = vector.broadcast %cst_39 : f32 to vector<8x128xf32>
    %70 = arith.maximumf %68, %69 : vector<8x128xf32>
    %c208 = arith.constant 208 : index
    %c0_40 = arith.constant 0 : index
    %71 = vector.load %arg2[%c208, %c0_40] : memref<232x256xbf16, #tpu.memory_space<vmem>>, vector<16x8xbf16>
    %72 = arith.truncf %70 : vector<8x128xf32> to vector<8x128xbf16>
    %cst_41 = arith.constant dense<0.000000e+00> : vector<16x128xf32>
    %73 = tpu.matmul %71, %72, %cst_41 {dimension_numbers = #tpu.dot_dimension_numbers<[1], [0], [0], [1], [0, 0, 1, 1], [], []>} : vector<16x8xbf16>, vector<8x128xbf16>, vector<16x128xf32> -> vector<16x128xf32>
    %c200_42 = arith.constant 200 : index
    %c0_43 = arith.constant 0 : index
    %74 = vector.load %arg3[%c200_42, %c0_43] : memref<224x1xf32, #tpu.memory_space<vmem>>, vector<16x1xf32>
    %75 = vector.broadcast %74 : vector<16x1xf32> to vector<16x128xf32>
    %76 = arith.addf %73, %75 : vector<16x128xf32>
    %cst_44 = arith.constant 0.000000e+00 : f32
    %77 = vector.broadcast %cst_44 : f32 to vector<16x128xf32>
    %78 = arith.maximumf %76, %77 : vector<16x128xf32>
    %c224_45 = arith.constant 224 : index
    %c0_46 = arith.constant 0 : index
    %79 = vector.load %arg2[%c224_45, %c0_46] : memref<232x256xbf16, #tpu.memory_space<vmem>>, vector<8x16xbf16>
    %80 = arith.truncf %78 : vector<16x128xf32> to vector<16x128xbf16>
    %cst_47 = arith.constant dense<0.000000e+00> : vector<8x128xf32>
    %81 = tpu.matmul %79, %80, %cst_47 {dimension_numbers = #tpu.dot_dimension_numbers<[1], [0], [0], [1], [0, 0, 1, 1], [], []>} : vector<8x16xbf16>, vector<16x128xbf16>, vector<8x128xf32> -> vector<8x128xf32>
    %c216_48 = arith.constant 216 : index
    %c0_49 = arith.constant 0 : index
    %82 = vector.load %arg3[%c216_48, %c0_49] : memref<224x1xf32, #tpu.memory_space<vmem>>, vector<8x1xf32>
    %83 = vector.broadcast %82 : vector<8x1xf32> to vector<8x128xf32>
    %84 = arith.addf %81, %83 : vector<8x128xf32>
    %cst_50 = arith.constant 0.000000e+00 : f32
    %85 = vector.broadcast %cst_50 : f32 to vector<8x128xf32>
    %86 = arith.subf %85, %84 : vector<8x128xf32>
    %87 = math.exp %86 : vector<8x128xf32>
    %cst_51 = arith.constant 1.000000e+00 : f32
    %88 = vector.broadcast %cst_51 : f32 to vector<8x128xf32>
    %89 = arith.addf %88, %87 : vector<8x128xf32>
    %90 = tpu.reciprocal %89 {approx = true} : vector<8x128xf32> -> vector<8x128xf32>
    %c8_52 = arith.constant 8 : index
    %c0_53 = arith.constant 0 : index
    %91 = vector.load %arg4[%c8_52, %c0_53] : memref<16x128xf32, #tpu.memory_space<vmem>>, vector<8x128xf32>
    tpu.vector_store %arg4[%c8_52, %c0_53], %90 {strides = array<i32>} : memref<16x128xf32, #tpu.memory_space<vmem>>, vector<8x128xf32>,
    return
  }
  func.func @transform_0(%arg0: i32) -> (i32, i32) {
    %c0_i32 = arith.constant 0 : i32
    %c0_i32_0 = arith.constant 0 : i32
    return %c0_i32, %arg0 : i32, i32
  }
  func.func @transform_1(%arg0: i32) -> (i32, i32) {
    %c0_i32 = arith.constant 0 : i32
    %c0_i32_0 = arith.constant 0 : i32
    %c0_i32_1 = arith.constant 0 : i32
    return %c0_i32, %c0_i32_0 : i32, i32
  }
  func.func @transform_2(%arg0: i32) -> (i32, i32) {
    %c0_i32 = arith.constant 0 : i32
    %c0_i32_0 = arith.constant 0 : i32
    %c0_i32_1 = arith.constant 0 : i32
    return %c0_i32, %c0_i32_0 : i32, i32
  }
  func.func @transform_3(%arg0: i32) -> (i32, i32) {
    %c0_i32 = arith.constant 0 : i32
    %c0_i32_0 = arith.constant 0 : i32
    return %c0_i32, %arg0 : i32, i32
  }
}

</mosaic_0001>

<bundles_post_ra>
// kernel: tranad_forward.1
= control target key start
LH: loop header
LB: loop body
LE: loop exit
PB: predicated region body
PF: predicated region fallthrough
CT: control target
= control target key end

     0   :  { %v1175_v0 = vmov 0   ;;  %vm62_vm0 = vcmask 654336   ;;  %vm302_vm1 = vcmask 1043456   ;;  %vm271_vm2 = vcmask 64512   ;;  %s1552_s2 = inlined_call_operand.vmem [shape: f32[224,1], index: 2, kind: input, shape index: {}]   ;;  %s1553_s0 = inlined_call_operand.vmem [shape: bf16[80,128], index: 0, kind: input, shape index: {}]   ;;  %s1554_s1 = inlined_call_operand.vmem [shape: bf16[232,256], index: 1, kind: input, shape index: {}]   ;;  %s1555_s3 = inlined_call_operand.vmem [shape: f32[16,128], index: 3, kind: output, shape index: {}]  }
   0x1   :  { %1164 = vset.pattern.permute.xlu0 %v1175_v0  ;;  %v26_v1 = vld [vmem:[%s1552_s2] sm:$0xff]  ;;  %1165 = vset.pattern.permute.xlu1 %v1175_v0  ;;  %v1137_v3 = vld [vmem:[%s1553_s0 + $0x18] sm:$0xff]  ;;  %v1136_v5 = vld [vmem:[%s1553_s0 + $0x10] sm:$0xff]  ;;  %vm408_vm3 = vcmask 261120   ;;  %vm489_vm4 = vcmask 130048  }
   0x2   :  { %v1138_v2 = vld [vmem:[%s1553_s0 + $0x20] sm:$0xff]  ;;  %29 = vperm.xlu0 %1164, %v26_v1   ;;  %1166 = vset.pattern.permute.xlu2 %v1175_v0  ;;  %v1208_v4 = vld [vmem:[%s1552_s2 + $0x78] sm:$0xff]  ;;  %v1135_v6 = vld [vmem:[%s1553_s0 + $0x8] sm:$0xff] }
   0x3   :  { %69 = vmatpush.bf16.msra.mxu0 %v1138_v2  ;;  %v112_v7 = vld [vmem:[%s1552_s2 + $0x60] sm:$0xff]  ;;  %v107_v10 = vld [vmem:[%s1552_s2 + $0x38] sm:$0xff]  ;;  %v106_v11 = vld [vmem:[%s1552_s2 + $0x30] sm:$0xff] }
   0x4   :  { %v1134_v8 = vld [vmem:[%s1553_s0] sm:$0xff]  ;;  %v1236_v12 = vld [vmem:[%s1552_s2 + $0x8] sm:$0xff]  ;;  %v483_v15 = vld [vmem:[%s1552_s2 + $0xd8] sm:$0xff] }
   0x5   :  { %v25_v9 = vld [vmem:[%s1554_s1] sm:$0xf]  ;;  %v396_v14 = vld [vmem:[%s1552_s2 + $0xa8] sm:$0xff]  ;;  %v589_v18 = vld [vmem:[%s1552_s2 + $0x18] sm:$0xff] }
   0x6   :  { %v1242_v13 = vld [vmem:[%s1552_s2 + $0xa0] sm:$0xff]  ;;  %v599_v16 = vld [vmem:[%s1552_s2 + $0x68] sm:$0xff]  ;;  %v604_v19 = vld [vmem:[%s1552_s2 + $0x90] sm:$0xff] }
   0x7   :  { %70 = vmatpush.bf16.msra.mxu0 %v1137_v3  ;;  %v1257_v17 = vld [vmem:[%s1552_s2 + $0x80] sm:$0xff]  ;;  %v109_v20 = vld [vmem:[%s1552_s2 + $0x48] sm:$0xff]  ;;  %v114_v23 = vld [vmem:[%s1552_s2 + $0x70] sm:$0xff] }
   0x8   :  { %198 = vperm.xlu1 %1165, %v1257_v17   ;;  %v880_v21 = vld [vmem:[%s1552_s2 + $0xc0] sm:$0xff]  ;;  %188 = vperm.xlu2 %1166, %v114_v23   ;;  %v111_v24 = vld [vmem:[%s1552_s2 + $0x58] sm:$0xff]  ;;  %v1284_v25 = vld [vmem:[%s1552_s2 + $0x10] sm:$0xff] }
   0x9   :  { %v108_v22 = vld [vmem:[%s1552_s2 + $0x40] sm:$0xff]  ;;  %v110_v29 = vld [vmem:[%s1552_s2 + $0x50] sm:$0xff]  ;;  %v1139_v32 = vld [vmem:[%s1554_s1 + $0x14] sm:$0xf0] }
   0xa   :  { %193 = vperm.xlu0 %1164, %v1208_v4   ;;  %v1021_v31 = vld [vmem:[%s1554_s1 + $0x10] sm:$0xf]  ;;  %v1025_v33 = vld [vmem:[%s1554_s1 + $0x20] sm:$0xf]  ;;  %v1140_v34 = vld [vmem:[%s1554_s1 + $0x24] sm:$0xf0] }
   0xb   :  { %71 = vmatpush.bf16.msra.mxu0 %v1136_v5  ;;  %v1022_v37 = vor.u32 %v1139_v32, %v1021_v31  ;;  %v1026_v38 = vor.u32 %v1140_v34, %v1025_v33  ;;  %v105_v40 = vld [vmem:[%s1552_s2 + $0x28] sm:$0xff]  ;;  %v104_v42 = vld [vmem:[%s1552_s2 + $0x20] sm:$0xff]  ;;  %v442_v43 = vld [vmem:[%s1552_s2 + $0xb0] sm:$0xff] }
   0xc   :  { %v117_v41 = vld [vmem:[%s1552_s2 + $0x88] sm:$0xff]  ;;  %v1029_v44 = vld [vmem:[%s1554_s1 + $0x30] sm:$0xf]  ;;  %v1141_v45 = vld [vmem:[%s1554_s1 + $0x34] sm:$0xf0] }
   0xd   :  { %v1030_v46 = vor.u32 %v1141_v45, %v1029_v44  ;;  %v119_v47 = vld [vmem:[%s1552_s2 + $0x98] sm:$0xff]  ;;  %v1033_v48 = vld [vmem:[%s1554_s1 + $0x40] sm:$0xf]  ;;  %v1142_v49 = vld [vmem:[%s1554_s1 + $0x44] sm:$0xf0] }
   0xe   :  { %v1034_v50 = vor.u32 %v1142_v49, %v1033_v48  ;;  %v443_v51 = vld [vmem:[%s1552_s2 + $0xb8] sm:$0xff]  ;;  %v1037_v52 = vld [vmem:[%s1554_s1 + $0x50] sm:$0xf]  ;;  %v1041_v55 = vld [vmem:[%s1554_s1 + $0x60] sm:$0xf] }
   0xf   :  { %72 = vmatpush.bf16.msra.mxu0 %v1135_v6  ;;  %v1143_v53 = vld [vmem:[%s1554_s1 + $0x54] sm:$0xf0]  ;;  %v1144_v56 = vld [vmem:[%s1554_s1 + $0x64] sm:$0xf0]  ;;  %v1045_v59 = vld [vmem:[%s1554_s1 + $0x70] sm:$0xf] }
  0x10   :  { %183 = vperm.xlu1 %1165, %v599_v16   ;;  %173 = vperm.xlu2 %1166, %v111_v24   ;;  %v1038_v54 = vor.u32 %v1143_v53, %v1037_v52  ;;  %v1042_v57 = vor.u32 %v1144_v56, %v1041_v55  ;;  %v925_v58 = vld [vmem:[%s1552_s2 + $0xc8] sm:$0xff]  ;;  %v1145_v60 = vld [vmem:[%s1554_s1 + $0x74] sm:$0xf0]  ;;  %v1049_v63 = vld [vmem:[%s1554_s1 + $0x80] sm:$0xf] }
  0x11   :  { %v1046_v61 = vor.u32 %v1145_v60, %v1045_v59  ;;  %v1146_v0 = vld [vmem:[%s1554_s1 + $0x84] sm:$0xf0]  ;;  %v926_v3 = vld [vmem:[%s1552_s2 + $0xd0] sm:$0xff] }
  0x12   :  { %178 = vperm.xlu0 %1164, %v112_v7   ;;  %v1050_v1 = vor.u32 %v1146_v0, %v1049_v63  ;;  %v1053_v6 = vld [vmem:[%s1554_s1 + $0x90] sm:$0xf] }
  0x13   :  { %73 = vmatpush.bf16.msra.mxu0 %v1134_v8 }
  0x16   :  { %1018 = vmatmul.msk.bf16.vlgmr.msra.gmra.mxu0 %vm62_vm0, %v25_v9 }
  0x18   :  { %163 = vperm.xlu1 %1165, %v109_v20   ;;  %168 = vperm.xlu2 %1166, %v110_v29  }
  0x1a   :  { %153 = vperm.xlu0 %1164, %v107_v10  }
  0x20   :  { %158 = vperm.xlu1 %1165, %v108_v22   ;;  %143 = vperm.xlu2 %1166, %v105_v40  }
  0x22   :  { %148 = vperm.xlu0 %1164, %v106_v11  }
  0x28   :  { %133 = vperm.xlu1 %1165, %v589_v18   ;;  %138 = vperm.xlu2 %1166, %v104_v42  }
  0x2a   :  { %123 = vperm.xlu0 %1164, %v1236_v12  }
  0x30   :  { %128 = vperm.xlu1 %1165, %v1284_v25   ;;  %213 = vperm.xlu2 %1166, %v119_v47  }
  0x32   :  { %218 = vperm.xlu0 %1164, %v1242_v13  }
  0x38   :  { %203 = vperm.xlu1 %1165, %v117_v41   ;;  %208 = vperm.xlu2 %1166, %v604_v19  }
  0x3a   :  { %399 = vperm.xlu0 %1164, %v396_v14   ;;  %v1148_v14 = vld [vmem:[%s1554_s1 + $0xa4] sm:$0xf0] }
  0x40   :  { %446 = vperm.xlu1 %1165, %v442_v43   ;;  %451 = vperm.xlu2 %1166, %v443_v51  }
  0x42   :  { %486 = vperm.xlu0 %1164, %v483_v15  }
  0x48   :  { %679 = vperm.xlu1 %1165, %v1208_v4   ;;  %684 = vperm.xlu2 %1166, %v1257_v17  }
  0x4a   :  { %669 = vperm.xlu0 %1164, %v599_v16  }
  0x50   :  { %674 = vperm.xlu1 %1165, %v114_v23   ;;  %659 = vperm.xlu2 %1166, %v111_v24  }
  0x52   :  { %664 = vperm.xlu0 %1164, %v112_v7   ;;  %v1147_v7 = vld [vmem:[%s1554_s1 + $0x94] sm:$0xf0] }
  0x53   :  { %v1054_v8 = vor.u32 %v1147_v7, %v1053_v6 }
  0x58   :  { %649 = vperm.xlu1 %1165, %v109_v20   ;;  %654 = vperm.xlu2 %1166, %v110_v29  }
  0x5a   :  { %639 = vperm.xlu0 %1164, %v107_v10  }
  0x60   :  { %644 = vperm.xlu1 %1165, %v108_v22   ;;  %629 = vperm.xlu2 %1166, %v105_v40  }
  0x62   :  { %634 = vperm.xlu0 %1164, %v106_v11   ;;  %v189_v2 = vpop.permute.xlu2 %188 }
  0x68   :  { %699 = vperm.xlu1 %1165, %v119_v47   ;;  %704 = vperm.xlu2 %1166, %v1242_v13   ;;  %v1057_v13 = vld [vmem:[%s1554_s1 + $0xa0] sm:$0xf] }
  0x69   :  { %v1058_v16 = vor.u32 %v1148_v14, %v1057_v13 }
  0x6a   :  { %619 = vperm.xlu0 %1164, %v589_v18   ;;  %v174_v5 = vpop.permute.xlu2 %173 }
  0x70   :  { %624 = vperm.xlu1 %1165, %v104_v42   ;;  %689 = vperm.xlu2 %1166, %v117_v41  }
  0x72   :  { %694 = vperm.xlu0 %1164, %v604_v19   ;;  %v169_v10 = vpop.permute.xlu2 %168 }
  0x74   :  { %v30_v26 = vpop.permute.xlu0 %29 }
  0x78   :  { %609 = vperm.xlu1 %1165, %v1236_v12   ;;  %614 = vperm.xlu2 %1166, %v1284_v25  }
  0x7a   :  { %883 = vperm.xlu0 %1164, %v880_v21   ;;  %v199_v62 = vpop.permute.xlu1 %198 }
  0x7c   :  { %v194_v11 = vpop.permute.xlu0 %193 }
  0x80   :  { %929 = vperm.xlu1 %1165, %v925_v58   ;;  %934 = vperm.xlu2 %1166, %v926_v3  }
  0x82   :  { %969 = vperm.xlu0 %1164, %v483_v15   ;;  %v184_v4 = vpop.permute.xlu1 %183  ;;  %v144_v15 = vpop.permute.xlu2 %143 }
  0x84   :  { %v179_v18 = vpop.permute.xlu0 %178 }
  0x8a   :  { %v164_v9 = vpop.permute.xlu1 %163  ;;  %v139_v21 = vpop.permute.xlu2 %138 }
  0x92   :  { %v159_v12 = vpop.permute.xlu1 %158 }
  0x93   :  { %v75_v27 = vpop.f32.mrf.mxu0 }
  0x94   :  { %v1287_v28 = vadd.f32 %v75_v27, %v30_v26  ;;  %v154_v27 = vpop.permute.xlu0 %153 }
  0x96   :  { %v79_v30 = vmax.f32 %v1287_v28, 0.0 }
  0x98   :  { %v100_v35 = vpack.c.bf16 %v79_v30, %v79_v30 }
  0x9a   :  { %v304_v36 = vsel %vm302_vm1, %v100_v35, 0  ;;  %v134_v19 = vpop.permute.xlu1 %133 }
  0x9b   :  { %v77_v39 = vpop.f32.mrf.mxu0  ;;  %313 = vmatpush.bf16.msrb.mxu0 %v304_v36  ;;  %1161 = vmatpush.bf16.msra.mxu1 %v304_v36 }
  0x9c   :  { %v149_v31 = vpop.permute.xlu0 %148 }
  0x9e   :  { %1059 = vmatmul.msk.bf16.vlgmr.msrb.gmra.mxu0 %vm271_vm2, %v1022_v37  ;;  %1060 = vmatmul.msk.bf16.vlgmr.msra.gmra.mxu1 %vm271_vm2, %v1026_v38 }
  0xa4   :  { %v124_v14 = vpop.permute.xlu0 %123 }
  0xae   :  { %1061 = vmatmul.msk.bf16.gmra.mxu1 %vm271_vm2, %v1030_v46 }
  0xbe   :  { %1062 = vmatmul.msk.bf16.gmra.mxu1 %vm271_vm2, %v1034_v50 }
  0xce   :  { %1063 = vmatmul.msk.bf16.gmra.mxu1 %vm271_vm2, %v1038_v54 }
  0xde   :  { %1064 = vmatmul.msk.bf16.gmra.mxu1 %vm271_vm2, %v1042_v57 }
  0xee   :  { %1065 = vmatmul.msk.bf16.gmra.mxu1 %vm271_vm2, %v1046_v61 }
  0xfe   :  { %1066 = vmatmul.msk.bf16.gmra.mxu1 %vm271_vm2, %v1050_v1 }
 0x10e   :  { %1067 = vmatmul.msk.bf16.gmra.mxu1 %vm271_vm2, %v1054_v8 }
 0x11b   :  { %v320_v17 = vpop.f32.mrf.mxu1 }
 0x11c   :  { %v321_v20 = vadd.f32 %v320_v17, %v134_v19 }
 0x11e   :  { %1068 = vmatmul.msk.bf16.gmra.mxu1 %vm271_vm2, %v1058_v16  ;;  %v367_v24 = vmax.f32 %v321_v20, 0.0  ;;  %v214_v16 = vpop.permute.xlu2 %213 }
 0x123   :  { %v322_v22 = vpop.f32.mrf.mxu1 }
 0x124   :  { %v323_v23 = vadd.f32 %v322_v22, %v139_v21  ;;  %v219_v21 = vpop.permute.xlu0 %218 }
 0x126   :  { %v368_v25 = vmax.f32 %v323_v23, 0.0 }
 0x128   :  { %v1393_v26 = vpack.c.bf16 %v368_v25, %v367_v24  ;;  %v209_v24 = vpop.permute.xlu2 %208 }
 0x12b   :  { %v325_v29 = vpop.f32.mrf.mxu1 }
 0x12c   :  { %v326_v30 = vadd.f32 %v325_v29, %v144_v15  ;;  %v129_v15 = vpop.permute.xlu1 %128 }
 0x12e   :  { %v369_v34 = vmax.f32 %v326_v30, 0.0 }
 0x133   :  { %v327_v32 = vpop.f32.mrf.mxu1 }
 0x134   :  { %v328_v33 = vadd.f32 %v327_v32, %v149_v31  ;;  %v204_v31 = vpop.permute.xlu1 %203 }
 0x136   :  { %v370_v35 = vmax.f32 %v328_v33, 0.0 }
 0x138   :  { %v388_v36 = vpack.c.bf16 %v370_v35, %v369_v34 }
 0x13b   :  { %v330_v37 = vpop.f32.mrf.mxu1 }
 0x13c   :  { %v331_v38 = vadd.f32 %v330_v37, %v154_v27 }
 0x13e   :  { %v371_v41 = vmax.f32 %v331_v38, 0.0 }
 0x143   :  { %v332_v39 = vpop.f32.mrf.mxu1 }
 0x144   :  { %v333_v40 = vadd.f32 %v332_v39, %v159_v12 }
 0x146   :  { %v372_v42 = vmax.f32 %v333_v40, 0.0 }
 0x148   :  { %v389_v43 = vpack.c.bf16 %v372_v42, %v371_v41 }
 0x14b   :  { %v335_v44 = vpop.f32.mrf.mxu1 }
 0x14c   :  { %v336_v7 = vadd.f32 %v335_v44, %v164_v9  ;;  %v385_v9 = vld [vmem:[%s1554_s1 + $0xb0] sm:$0xff] }
 0x14d   :  { %v403_v20 = vunpack.c.l.b16 %v385_v9  ;;  %v404_v38 = vunpack.c.h.b16 %v385_v9 }
 0x14f   :  { %v405_v32 = vpack.c.b16 %v403_v20, %v403_v20  ;;  %v406_v41 = vpack.c.b16 %v404_v38, %v404_v38 }
 0x153   :  { %v337_v45 = vpop.f32.mrf.mxu1 }
 0x154   :  { %v338_v1 = vadd.f32 %v337_v45, %v169_v10 }
 0x156   :  { %v374_v12 = vmax.f32 %v338_v1, 0.0 }
 0x15b   :  { %v340_v46 = vpop.f32.mrf.mxu1 }
 0x15c   :  { %v341_v61 = vadd.f32 %v340_v46, %v174_v5 }
 0x15e   :  { %v375_v8 = vmax.f32 %v341_v61, 0.0 }
 0x163   :  { %v342_v47 = vpop.f32.mrf.mxu1 }
 0x164   :  { %v343_v58 = vadd.f32 %v342_v47, %v179_v18  ;;  %v1072_v47 = vld [vmem:[%s1554_s1 + $0xb8] sm:$0xf] }
 0x166   :  { %v376_v3 = vmax.f32 %v343_v58, 0.0 }
 0x16b   :  { %v345_v48 = vpop.f32.mrf.mxu1 }
 0x16c   :  { %v346_v55 = vadd.f32 %v345_v48, %v184_v4  ;;  %v1149_v48 = vld [vmem:[%s1554_s1 + $0xbc] sm:$0xf0] }
 0x16e   :  { %v377_v63 = vmax.f32 %v346_v55, 0.0  ;;  %v447_v55 = vpop.permute.xlu1 %446 }
 0x173   :  { %v347_v49 = vpop.f32.mrf.mxu1 }
 0x174   :  { %v348_v53 = vadd.f32 %v347_v49, %v189_v2  ;;  %v391_v2 = vpack.c.bf16 %v376_v3, %v375_v8 }
 0x176   :  { %v378_v59 = vmax.f32 %v348_v53, 0.0 }
 0x178   :  { %v392_v6 = vpack.c.bf16 %v378_v59, %v377_v63 }
 0x17b   :  { %v350_v50 = vpop.f32.mrf.mxu1 }
 0x17c   :  { %v351_v51 = vadd.f32 %v350_v50, %v194_v11  ;;  %v315_v11 = vpop.f32.mrf.mxu0 }
 0x17d   :  { %v316_v18 = vadd.f32 %v315_v11, %v124_v14 }
 0x17e   :  { %v379_v56 = vmax.f32 %v351_v51, 0.0 }
 0x17f   :  { %v365_v22 = vmax.f32 %v316_v18, 0.0 }
 0x183   :  { %v352_v52 = vpop.f32.mrf.mxu1 }
 0x184   :  { %v353_v54 = vadd.f32 %v352_v52, %v199_v62  ;;  %v373_v62 = vmax.f32 %v336_v7, 0.0  ;;  %v317_v5 = vpop.f32.mrf.mxu0  ;;  %v1073_v52 = vor.u32 %v1149_v48, %v1072_v47 }
 0x185   :  { %v318_v10 = vadd.f32 %v317_v5, %v129_v15 }
 0x186   :  { %v380_v57 = vmax.f32 %v353_v54, 0.0  ;;  %v390_v13 = vpack.c.bf16 %v374_v12, %v373_v62  ;;  %v23_v62 = vld [vmem:[%s1553_s0 + $0x20] sm:$0xff]  }
 0x187   :  { %v366_v19 = vmax.f32 %v318_v10, 0.0  ;;  %v521_v14 = vunpack.c.h.bf16 %v23_v62 }
 0x188   :  { %v393_v60 = vpack.c.bf16 %v380_v57, %v379_v56  ;;  %v452_v57 = vpop.permute.xlu2 %451 }
 0x189   :  { %v386_v30 = vpack.c.bf16 %v366_v19, %v365_v22  ;;  %v17_v22 = vld [vmem:[%s1553_s0 + $0x8] sm:$0xff]  }
 0x18a   :  { %412 = vmatpush.bf16.msra.mxu2 %v393_v60 }
 0x18b   :  { %v355_v0 = vpop.f32.mrf.mxu1 }
 0x18c   :  { %v356_v33 = vadd.f32 %v355_v0, %v204_v31  ;;  %v481_v0 = vld [vmem:[%s1554_s1 + $0xe0] sm:$0xf] }
 0x18e   :  { %413 = vmatpush.bf16.msra.mxu2 %v392_v6  ;;  %v381_v39 = vmax.f32 %v356_v33, 0.0 }
 0x192   :  { %414 = vmatpush.bf16.msra.mxu2 %v391_v2 }
 0x193   :  { %v357_v4 = vpop.f32.mrf.mxu1 }
 0x194   :  { %v358_v27 = vadd.f32 %v357_v4, %v209_v24  ;;  %v21_v4 = vld [vmem:[%s1553_s0 + $0x18] sm:$0xff]  }
 0x195   :  { %v518_v15 = vunpack.c.l.bf16 %v21_v4  ;;  %v519_v5 = vunpack.c.h.bf16 %v21_v4 }
 0x196   :  { %415 = vmatpush.bf16.msra.mxu2 %v390_v13  ;;  %v520_v13 = vunpack.c.l.bf16 %v23_v62 }
 0x19a   :  { %416 = vmatpush.bf16.msra.mxu2 %v389_v43 }
 0x19b   :  { %v360_v17 = vpop.f32.mrf.mxu1 }
 0x19c   :  { %v361_v23 = vadd.f32 %v360_v17, %v214_v16  ;;  %v19_v16 = vld [vmem:[%s1553_s0 + $0x10] sm:$0xff]  }
 0x19d   :  { %v516_v10 = vunpack.c.l.bf16 %v19_v16  ;;  %v517_v18 = vunpack.c.h.bf16 %v19_v16 }
 0x19e   :  { %417 = vmatpush.bf16.msra.mxu2 %v388_v36  ;;  %v383_v34 = vmax.f32 %v361_v23, 0.0  ;;  %v382_v36 = vmax.f32 %v358_v27, 0.0  ;;  %v514_v27 = vunpack.c.l.bf16 %v17_v22 }
 0x1a0   :  { %v394_v40 = vpack.c.bf16 %v382_v36, %v381_v39 }
 0x1a2   :  { %418 = vmatpush.bf16.msra.mxu2 %v1393_v26  ;;  %v400_v26 = vpop.permute.xlu0 %399 }
 0x1a3   :  { %v362_v25 = vpop.f32.mrf.mxu1 }
 0x1a4   :  { %v363_v29 = vadd.f32 %v362_v25, %v219_v21 }
 0x1a6   :  { %v384_v35 = vmax.f32 %v363_v29, 0.0  ;;  %419 = vmatpush.bf16.msra.mxu2 %v386_v30  ;;  %v515_v29 = vunpack.c.h.bf16 %v17_v22  ;;  %v680_v22 = vpop.permute.xlu1 %679 }
 0x1a8   :  { %v395_v37 = vpack.c.bf16 %v384_v35, %v383_v34  ;;  %v15_v34 = vld [vmem:[%s1553_s0] sm:$0xff]  }
 0x1a9   :  { %420 = vmatmul.bf16.vlgmr.msra.gmra.mxu2 %v405_v32  ;;  %v512_v36 = vunpack.c.l.bf16 %v15_v34 }
 0x1aa   :  { %431 = vmatpush.bf16.msra.mxu0 %v395_v37  ;;  %v487_v1 = vpop.permute.xlu0 %486  ;;  %v513_v37 = vunpack.c.h.bf16 %v15_v34 }
 0x1ae   :  { %432 = vmatpush.bf16.msra.mxu0 %v394_v40 }
 0x1b1   :  { %1069 = vmatmul.msk.bf16.vlgmr.msra.gmra.mxu0 %vm408_vm3, %v406_v41 }
 0x22c   :  { %v421_v42 = vpop.f32.mrf.mxu2 }
 0x22d   :  { %v422_v43 = vadd.f32 %v421_v42, %v400_v26 }
 0x22e   :  { %v434_v44 = vpop.f32.mrf.mxu0 }
 0x22f   :  { %v435_v45 = vadd.f32 %v434_v44, %v422_v43 }
 0x231   :  { %v438_v46 = vmax.f32 %v435_v45, 0.0 }
 0x233   :  { %v441_v49 = vpack.c.bf16 %v438_v46, %v438_v46 }
 0x234   :  { %v423_v50 = vpop.f32.mrf.mxu2 }
 0x235   :  { %v463_v51 = vsel %vm302_vm1, %v441_v49, 0  ;;  %v547_v50 = vld [vmem:[%s1554_s1 + $0x8] sm:$0xf] }
 0x236   :  { %v436_v53 = vpop.f32.mrf.mxu0  ;;  %472 = vmatpush.bf16.msra.mxu3 %v463_v51 }
 0x239   :  { %1074 = vmatmul.msk.bf16.vlgmr.msra.gmra.mxu3 %vm271_vm2, %v1073_v52 }
 0x2bc   :  { %v474_v54 = vpop.f32.mrf.mxu3 }
 0x2bd   :  { %v475_v56 = vadd.f32 %v474_v54, %v447_v55  ;;  %v1079_v54 = vld [vmem:[%s1554_s1 + $0x10] sm:$0xf]  ;;  %v1150_v55 = vld [vmem:[%s1554_s1 + $0x14] sm:$0xf0] }
 0x2bf   :  { %v479_v60 = vmax.f32 %v475_v56, 0.0  ;;  %v1103_v56 = vld [vmem:[%s1554_s1 + $0x70] sm:$0xf] }
 0x2c4   :  { %v476_v58 = vpop.f32.mrf.mxu3 }
 0x2c5   :  { %v477_v59 = vadd.f32 %v476_v58, %v452_v57  ;;  %v1156_v57 = vld [vmem:[%s1554_s1 + $0x74] sm:$0xf0] }
 0x2c7   :  { %v480_v61 = vmax.f32 %v477_v59, 0.0  ;;  %v1080_v59 = vor.u32 %v1150_v55, %v1079_v54 }
 0x2c9   :  { %v482_v63 = vpack.c.bf16 %v480_v61, %v479_v60  ;;  %v1104_v60 = vor.u32 %v1156_v57, %v1103_v56 }
 0x2cb   :  { %500 = vmatpush.bf16.msrb.mxu0 %v482_v63  ;;  %v1083_v63 = vld [vmem:[%s1554_s1 + $0x20] sm:$0xf] }
 0x2ce   :  { %1075 = vmatmul.msk.bf16.vlgmr.msrb.gmra.mxu0 %vm489_vm4, %v481_v0  ;;  %v1151_v0 = vld [vmem:[%s1554_s1 + $0x24] sm:$0xf0] }
 0x34b   :  { %v502_v3 = vpop.f32.mrf.mxu0 }
 0x34c   :  { %v503_v6 = vadd.f32 %v502_v3, %v487_v1  ;;  %v1107_v1 = vld [vmem:[%s1554_s1 + $0x80] sm:$0xf]  ;;  %v1157_v3 = vld [vmem:[%s1554_s1 + $0x84] sm:$0xf0] }
 0x34e   :  { %v506_v7 = vsub.f32 0.0, %v503_v6  ;;  %v1084_v6 = vor.u32 %v1151_v0, %v1083_v63 }
 0x350   :  { %v507_v8 = vmul.f32 1.442695, %v506_v7  ;;  %v1108_v7 = vor.u32 %v1157_v3, %v1107_v1 }
 0x352   :  { %1167 = vpow2.f32 %v507_v8  ;;  %v1087_v8 = vld [vmem:[%s1554_s1 + $0x30] sm:$0xf] }
 0x353   :  { %v504_v11 = vpop.f32.mrf.mxu0 }
 0x354   :  { %v1152_v11 = vld [vmem:[%s1554_s1 + $0x34] sm:$0xf0] }
 0x355   :  { %v1088_v62 = vor.u32 %v1152_v11, %v1087_v8 }
 0x358   :  { %v1168_v12 = vpop.eup %1167 }
 0x359   :  { %v509_v2 = vadd.f32 1.0, %v1168_v12  ;;  %v1111_v12 = vld [vmem:[%s1554_s1 + $0x90] sm:$0xf] }
 0x35b   :  { %1169 = vrcp.f32 %v509_v2  ;;  %v1158_v2 = vld [vmem:[%s1554_s1 + $0x94] sm:$0xf0] }
 0x35c   :  { %v1112_v4 = vor.u32 %v1158_v2, %v1111_v12 }
 0x361   :  { %v1170_v17 = vpop.eup %1169 }
 0x362   :  { %v530_v9 = vsub.f32 %v1170_v17, %v520_v13  ;;  %v531_v19 = vsub.f32 %v1170_v17, %v521_v14  ;;  %v528_v20 = vsub.f32 %v1170_v17, %v518_v15  ;;  %v529_v21 = vsub.f32 %v1170_v17, %v519_v5  ;;  %511 = vst [vmem:[%s1555_s3] sm:$0xff] %v1170_v17  ;;  %v1091_v13 = vld [vmem:[%s1554_s1 + $0x40] sm:$0xf]  ;;  %v1153_v14 = vld [vmem:[%s1554_s1 + $0x44] sm:$0xf0] }
 0x363   :  { %v526_v25 = vsub.f32 %v1170_v17, %v516_v10  ;;  %v527_v33 = vsub.f32 %v1170_v17, %v517_v18  ;;  %v524_v35 = vsub.f32 %v1170_v17, %v514_v27  ;;  %v525_v41 = vsub.f32 %v1170_v17, %v515_v29  ;;  %v1115_v15 = vld [vmem:[%s1554_s1 + $0xa0] sm:$0xf]  ;;  %v1159_v5 = vld [vmem:[%s1554_s1 + $0xa4] sm:$0xf0]  ;;  %v1095_v10 = vld [vmem:[%s1554_s1 + $0x50] sm:$0xf] }
 0x364   :  { %v540_v23 = vmul.f32 %v530_v9, %v530_v9  ;;  %v541_v24 = vmul.f32 %v531_v19, %v531_v19  ;;  %v538_v31 = vmul.f32 %v528_v20, %v528_v20  ;;  %v539_v32 = vmul.f32 %v529_v21, %v529_v21  ;;  %v1154_v18 = vld [vmem:[%s1554_s1 + $0x54] sm:$0xf0]  ;;  %v1099_v19 = vld [vmem:[%s1554_s1 + $0x60] sm:$0xf]  ;;  %v1155_v20 = vld [vmem:[%s1554_s1 + $0x64] sm:$0xf0] }
 0x365   :  { %v536_v39 = vmul.f32 %v526_v25, %v526_v25  ;;  %v537_v40 = vmul.f32 %v527_v33, %v527_v33  ;;  %v534_v26 = vmul.f32 %v524_v35, %v524_v35  ;;  %v535_v43 = vmul.f32 %v525_v41, %v525_v41 }
 0x366   :  { %v546_v30 = vpack.c.bf16 %v541_v24, %v540_v23  ;;  %v545_v38 = vpack.c.bf16 %v539_v32, %v538_v31  ;;  %v522_v44 = vsub.f32 %v1170_v17, %v512_v36  ;;  %v523_v45 = vsub.f32 %v1170_v17, %v513_v37  ;;  %v685_v23 = vpop.permute.xlu2 %684  ;;  %v675_v24 = vpop.permute.xlu1 %674 }
 0x367   :  { %v544_v42 = vpack.c.bf16 %v537_v40, %v536_v39  ;;  %v543_v46 = vpack.c.bf16 %v535_v43, %v534_v26  ;;  %v1092_v16 = vor.u32 %v1153_v14, %v1091_v13  ;;  %v1116_v17 = vor.u32 %v1159_v5, %v1115_v15  ;;  %v670_v32 = vpop.permute.xlu0 %669 }
 0x368   :  { %554 = vmatpush.bf16.msrb.mxu3 %v546_v30  ;;  %v532_v47 = vmul.f32 %v522_v44, %v522_v44  ;;  %v533_v48 = vmul.f32 %v523_v45, %v523_v45  ;;  %v1096_v9 = vor.u32 %v1154_v18, %v1095_v10  ;;  %v1100_v21 = vor.u32 %v1155_v20, %v1099_v19 }
 0x36a   :  { %v542_v49 = vpack.c.bf16 %v533_v48, %v532_v47 }
 0x36c   :  { %555 = vmatpush.bf16.msrb.mxu3 %v545_v38 }
 0x36e   :  { %v1506_v25 = vpop.permute.xlu2 %659  ;;  %v1508_v27 = vpop.permute.xlu1 %649 }
 0x36f   :  { %v1516_v35 = vpop.permute.xlu0 %664 }
 0x370   :  { %556 = vmatpush.bf16.msrb.mxu3 %v544_v42 }
 0x374   :  { %557 = vmatpush.bf16.msrb.mxu3 %v543_v46 }
 0x376   :  { %v1510_v29 = vpop.permute.xlu2 %654  ;;  %v1512_v30 = vpop.permute.xlu1 %644 }
 0x377   :  { %v1518_v40 = vpop.permute.xlu0 %639 }
 0x378   :  { %558 = vmatpush.bf16.msrb.mxu3 %v542_v49 }
 0x37b   :  { %1076 = vmatmul.msk.bf16.vlgmr.msrb.gmra.mxu3 %vm62_vm0, %v547_v50 }
 0x37e   :  { %v1514_v31 = vpop.permute.xlu2 %629  ;;  %v700_v33 = vpop.permute.xlu1 %699 }
 0x37f   :  { %v1520_v48 = vpop.permute.xlu0 %634 }
 0x386   :  { %v705_v34 = vpop.permute.xlu2 %704  ;;  %v625_v36 = vpop.permute.xlu1 %624 }
 0x38e   :  { %v690_v37 = vpop.permute.xlu2 %689  ;;  %v610_v41 = vpop.permute.xlu1 %609 }
 0x396   :  { %v615_v26 = vpop.permute.xlu2 %614 }
 0x3fe   :  { %v560_v51 = vpop.f32.mrf.mxu3 }
 0x3ff   :  { %v564_v52 = vadd.f32 %v560_v51, %v1287_v28 }
 0x401   :  { %v565_v53 = vmax.f32 %v564_v52, 0.0  ;;  %v620_v52 = vpop.permute.xlu0 %619 }
 0x403   :  { %v586_v58 = vpack.c.bf16 %v565_v53, %v565_v53 }
 0x405   :  { %v788_v28 = vsel %vm302_vm1, %v586_v58, 0 }
 0x406   :  { %v562_v61 = vpop.f32.mrf.mxu3  ;;  %797 = vmatpush.bf16.msrb.mxu2 %v788_v28  ;;  %1162 = vmatpush.bf16.msra.mxu3 %v788_v28 }
 0x409   :  { %1117 = vmatmul.msk.bf16.vlgmr.msrb.gmra.mxu2 %vm271_vm2, %v1080_v59  ;;  %1123 = vmatmul.msk.bf16.vlgmr.msra.gmra.mxu3 %vm271_vm2, %v1104_v60  ;;  %v695_v14 = vpop.permute.xlu0 %694 }
 0x419   :  { %1118 = vmatmul.msk.bf16.gmra.mxu2 %vm271_vm2, %v1084_v6  ;;  %1124 = vmatmul.msk.bf16.gmra.mxu3 %vm271_vm2, %v1108_v7 }
 0x429   :  { %1119 = vmatmul.msk.bf16.gmra.mxu2 %vm271_vm2, %v1088_v62  ;;  %1125 = vmatmul.msk.bf16.gmra.mxu3 %vm271_vm2, %v1112_v4 }
 0x439   :  { %1120 = vmatmul.msk.bf16.gmra.mxu2 %vm271_vm2, %v1092_v16  ;;  %1126 = vmatmul.msk.bf16.gmra.mxu3 %vm271_vm2, %v1116_v17 }
 0x449   :  { %1121 = vmatmul.msk.bf16.gmra.mxu2 %vm271_vm2, %v1096_v9 }
 0x459   :  { %1122 = vmatmul.msk.bf16.gmra.mxu2 %vm271_vm2, %v1100_v21 }
 0x48c   :  { %v799_v38 = vpop.f32.mrf.mxu2  ;;  %v829_v39 = vpop.f32.mrf.mxu3 }
 0x48d   :  { %v800_v42 = vadd.f32 %v799_v38, %v610_v41  ;;  %v830_v59 = vadd.f32 %v829_v39, %v670_v32  ;;  %v869_v32 = vld [vmem:[%s1554_s1 + $0xc8] sm:$0xff] }
 0x48f   :  { %v849_v46 = vmax.f32 %v800_v42, 0.0  ;;  %v861_v7 = vmax.f32 %v830_v59, 0.0 }
 0x494   :  { %v801_v43 = vpop.f32.mrf.mxu2  ;;  %v831_v44 = vpop.f32.mrf.mxu3 }
 0x495   :  { %v802_v45 = vadd.f32 %v801_v43, %v615_v26  ;;  %v832_v57 = vadd.f32 %v831_v44, %v675_v24 }
 0x497   :  { %v850_v47 = vmax.f32 %v802_v45, 0.0  ;;  %v862_v1 = vmax.f32 %v832_v57, 0.0 }
 0x499   :  { %v1522_v49 = vpack.c.bf16 %v850_v47, %v849_v46  ;;  %v876_v12 = vpack.c.bf16 %v862_v1, %v861_v7  ;;  %v930_v7 = vpop.permute.xlu1 %929 }
 0x49c   :  { %v804_v50 = vpop.f32.mrf.mxu2  ;;  %v834_v51 = vpop.f32.mrf.mxu3 }
 0x49d   :  { %v805_v53 = vadd.f32 %v804_v50, %v620_v52  ;;  %v835_v54 = vadd.f32 %v834_v51, %v680_v22 }
 0x49f   :  { %v851_v60 = vmax.f32 %v805_v53, 0.0  ;;  %v863_v61 = vmax.f32 %v835_v54, 0.0 }
 0x4a4   :  { %v806_v55 = vpop.f32.mrf.mxu2  ;;  %v836_v56 = vpop.f32.mrf.mxu3 }
 0x4a5   :  { %v807_v58 = vadd.f32 %v806_v55, %v625_v36  ;;  %v837_v28 = vadd.f32 %v836_v56, %v685_v23 }
 0x4a7   :  { %v852_v63 = vmax.f32 %v807_v58, 0.0  ;;  %v864_v0 = vmax.f32 %v837_v28, 0.0  ;;  %v884_v58 = vpop.permute.xlu0 %883 }
 0x4a9   :  { %v871_v3 = vpack.c.bf16 %v852_v63, %v851_v60  ;;  %v877_v6 = vpack.c.bf16 %v864_v0, %v863_v61  ;;  %v1130_v61 = vld [vmem:[%s1554_s1 + $0xd0] sm:$0xf]  ;;  %v1160_v63 = vld [vmem:[%s1554_s1 + $0xd4] sm:$0xf0] }
 0x4ab   :  { %895 = vmatpush.bf16.msra.mxu0 %v877_v6 }
 0x4ac   :  { %v809_v8 = vpop.f32.mrf.mxu2  ;;  %v839_v11 = vpop.f32.mrf.mxu3 }
 0x4ad   :  { %v840_v18 = vadd.f32 %v839_v11, %v690_v37  ;;  %v935_v11 = vpop.permute.xlu2 %934 }
 0x4af   :  { %896 = vmatpush.bf16.msra.mxu0 %v876_v12  ;;  %v865_v22 = vmax.f32 %v840_v18, 0.0 }
 0x4b4   :  { %v811_v2 = vpop.f32.mrf.mxu2  ;;  %v841_v62 = vpop.f32.mrf.mxu3 }
 0x4b5   :  { %v842_v17 = vadd.f32 %v841_v62, %v695_v14  ;;  %v812_v52 = vadd.f32 %v811_v2, %v1520_v48  ;;  %v964_v14 = vld [vmem:[%s1554_s1 + $0xe0] sm:$0xf] }
 0x4b7   :  { %v866_v20 = vmax.f32 %v842_v17, 0.0 }
 0x4b9   :  { %v878_v24 = vpack.c.bf16 %v866_v20, %v865_v22 }
 0x4bc   :  { %v814_v4 = vpop.f32.mrf.mxu2  ;;  %v844_v13 = vpop.f32.mrf.mxu3 }
 0x4bd   :  { %v845_v15 = vadd.f32 %v844_v13, %v700_v33  ;;  %v888_v33 = vunpack.c.h.b16 %v869_v32  ;;  %v815_v50 = vadd.f32 %v814_v4, %v1518_v40 }
 0x4bf   :  { %v867_v9 = vmax.f32 %v845_v15, 0.0  ;;  %v890_v38 = vpack.c.b16 %v888_v33, %v888_v33  ;;  %v855_v54 = vmax.f32 %v815_v50, 0.0  ;;  %v970_v15 = vpop.permute.xlu0 %969 }
 0x4c4   :  { %v816_v5 = vpop.f32.mrf.mxu2  ;;  %v846_v16 = vpop.f32.mrf.mxu3 }
 0x4c5   :  { %v847_v10 = vadd.f32 %v846_v16, %v705_v34  ;;  %v817_v45 = vadd.f32 %v816_v5, %v1512_v30  ;;  %v887_v30 = vunpack.c.l.b16 %v869_v32 }
 0x4c7   :  { %v868_v19 = vmax.f32 %v847_v10, 0.0  ;;  %v889_v57 = vpack.c.b16 %v887_v30, %v887_v30 }
 0x4c9   :  { %v879_v21 = vpack.c.bf16 %v868_v19, %v867_v9 }
 0x4cb   :  { %914 = vmatpush.bf16.msrb.mxu3 %v879_v21 }
 0x4cc   :  { %v819_v23 = vpop.f32.mrf.mxu2 }
 0x4cd   :  { %v820_v42 = vadd.f32 %v819_v23, %v1508_v27 }
 0x4cf   :  { %915 = vmatpush.bf16.msrb.mxu3 %v878_v24  ;;  %v857_v51 = vmax.f32 %v820_v42, 0.0 }
 0x4d2   :  { %1127 = vmatmul.msk.bf16.vlgmr.msrb.gmra.mxu3 %vm408_vm3, %v890_v38 }
 0x4d4   :  { %v821_v36 = vpop.f32.mrf.mxu2 }
 0x4d5   :  { %v822_v41 = vadd.f32 %v821_v36, %v1510_v29  ;;  %v810_v29 = vadd.f32 %v809_v8, %v1514_v31 }
 0x4d7   :  { %v858_v46 = vmax.f32 %v822_v41, 0.0  ;;  %v853_v55 = vmax.f32 %v810_v29, 0.0 }
 0x4d9   :  { %v874_v53 = vpack.c.bf16 %v858_v46, %v857_v51 }
 0x4dc   :  { %v824_v34 = vpop.f32.mrf.mxu2 }
 0x4dd   :  { %v825_v37 = vadd.f32 %v824_v34, %v1506_v25  ;;  %v856_v25 = vmax.f32 %v817_v45, 0.0 }
 0x4df   :  { %v859_v43 = vmax.f32 %v825_v37, 0.0  ;;  %v873_v27 = vpack.c.bf16 %v856_v25, %v855_v54 }
 0x4e4   :  { %v826_v39 = vpop.f32.mrf.mxu2 }
 0x4e5   :  { %v827_v26 = vadd.f32 %v826_v39, %v1516_v35  ;;  %v854_v35 = vmax.f32 %v812_v52, 0.0 }
 0x4e7   :  { %v860_v44 = vmax.f32 %v827_v26, 0.0  ;;  %v872_v56 = vpack.c.bf16 %v854_v35, %v853_v55 }
 0x4e9   :  { %v875_v47 = vpack.c.bf16 %v860_v44, %v859_v43 }
 0x4eb   :  { %897 = vmatpush.bf16.msra.mxu0 %v875_v47 }
 0x4ef   :  { %898 = vmatpush.bf16.msra.mxu0 %v874_v53 }
 0x4f3   :  { %899 = vmatpush.bf16.msra.mxu0 %v873_v27 }
 0x4f7   :  { %900 = vmatpush.bf16.msra.mxu0 %v872_v56 }
 0x4fb   :  { %901 = vmatpush.bf16.msra.mxu0 %v871_v3  ;;  %v1131_v3 = vor.u32 %v1160_v63, %v1130_v61 }
 0x4ff   :  { %902 = vmatpush.bf16.msra.mxu0 %v1522_v49 }
 0x502   :  { %903 = vmatmul.bf16.vlgmr.msra.gmra.mxu0 %v889_v57 }
 0x555   :  { %v917_v40 = vpop.f32.mrf.mxu3 }
 0x55d   :  { %v919_v48 = vpop.f32.mrf.mxu3 }
 0x57f   :  { %v904_v28 = vpop.f32.mrf.mxu0 }
 0x580   :  { %v905_v59 = vadd.f32 %v904_v28, %v884_v58 }
 0x582   :  { %v918_v31 = vadd.f32 %v917_v40, %v905_v59 }
 0x584   :  { %v921_v60 = vmax.f32 %v918_v31, 0.0 }
 0x586   :  { %v924_v0 = vpack.c.bf16 %v921_v60, %v921_v60 }
 0x587   :  { %v906_v1 = vpop.f32.mrf.mxu0 }
 0x588   :  { %v946_v49 = vsel %vm302_vm1, %v924_v0, 0 }
 0x589   :  { %955 = vmatpush.bf16.msra.mxu3 %v946_v49 }
 0x58c   :  { %1132 = vmatmul.msk.bf16.vlgmr.msra.gmra.mxu3 %vm271_vm2, %v1131_v3 }
 0x60f   :  { %v957_v6 = vpop.f32.mrf.mxu3 }
 0x610   :  { %v958_v8 = vadd.f32 %v957_v6, %v930_v7 }
 0x612   :  { %v962_v62 = vmax.f32 %v958_v8, 0.0 }
 0x617   :  { %v959_v12 = vpop.f32.mrf.mxu3 }
 0x618   :  { %v960_v2 = vadd.f32 %v959_v12, %v935_v11 }
 0x61a   :  { %v963_v4 = vmax.f32 %v960_v2, 0.0 }
 0x61c   :  { %v965_v13 = vpack.c.bf16 %v963_v4, %v962_v62 }
 0x61e   :  { %982 = vmatpush.bf16.msrb.mxu0 %v965_v13 }
 0x621   :  { %1133 = vmatmul.msk.bf16.vlgmr.msrb.gmra.mxu0 %vm489_vm4, %v964_v14 }
 0x69e   :  { %v984_v5 = vpop.f32.mrf.mxu0 }
 0x69f   :  { %v985_v16 = vadd.f32 %v984_v5, %v970_v15 }
 0x6a1   :  { %v988_v17 = vsub.f32 0.0, %v985_v16 }
 0x6a3   :  { %v989_v10 = vmul.f32 1.442695, %v988_v17 }
 0x6a5   :  { %1171 = vpow2.f32 %v989_v10 }
 0x6a6   :  { %v986_v18 = vpop.f32.mrf.mxu0 }
 0x6ab   :  { %v1172_v9 = vpop.eup %1171 }
 0x6ac   :  { %v991_v19 = vadd.f32 1.0, %v1172_v9 }
 0x6ae   :  { %1173 = vrcp.f32 %v991_v19 }
 0x6b4   :  { %v1174_v20 = vpop.eup %1173 }
 0x6b5   :  { %993 = vst [vmem:[%s1555_s3 + $0x8] sm:$0xff] %v1174_v20 }

</bundles_post_ra>
